<compile_context>
chip_gen: v6e
topology: v6e:2x2x1
jax: 0.10.0
libtpu: 0.0.40
codegen_flags: <defaults>
</compile_context>

<pallas_src>
import functools

import numpy as np
import jax
import jax.numpy as jnp
from jax.experimental import pallas as pl
from jax.experimental.pallas import tpu as pltpu


def _round_up(x, m):
    return ((x + m - 1) // m) * m


def _positional_encoding_table(seq_len, d_model):
    """(S, D) float32 PE table computed exactly like the reference module."""
    positions = np.arange(seq_len)
    dimensions = np.arange(d_model)
    denominator = np.power(10000.0, 2 * dimensions / d_model)
    angles = positions.reshape(-1, 1) / denominator.reshape(1, -1)
    pe = np.zeros_like(angles)
    pe[:, 0::2] = np.sin(angles[:, 0::2])
    pe[:, 1::2] = np.cos(angles[:, 1::2])
    return pe.astype(np.float32)


def _embed_pe_kernel(ids_ref, emb_ref, pe_ref, out_ref, *, use_onehot):
    """One grid step produces the (tb, D) tile for (seq-block s, batch b).

    ids_ref : VMEM (B, tb)   int32 token ids of seq block s, all batches.
    emb_ref : VMEM (V, D)    f32 embedding table, resident for the whole grid.
    pe_ref  : VMEM (tb, D)   f32 positional-encoding rows for seq block s.
    out_ref : VMEM (1, tb, D) output tile for (b, s).
    """
    b = pl.program_id(1)
    vocab = emb_ref.shape[0]
    ids_vec = jnp.clip(ids_ref[b, :], 0, vocab - 1)          # (tb,) int32

    if use_onehot:
        # Small-vocab path: one-hot on the MXU.  One-hot entries are exactly
        # 0/1, so with HIGHEST precision the selection is numerically exact.
        tb = pe_ref.shape[0]
        vocab_iota = jax.lax.broadcasted_iota(jnp.int32, (tb, vocab), 1)
        onehot = (vocab_iota == ids_vec[:, None]).astype(jnp.float32)
        rows = jnp.dot(onehot, emb_ref[...],
                       preferred_element_type=jnp.float32,
                       precision=jax.lax.Precision.HIGHEST)
    else:
        # General path: block-wide row gather from the resident table.
        rows = jnp.take(emb_ref[...], ids_vec, axis=0, mode="clip")

    out_ref[0] = (rows + pe_ref[...]).astype(out_ref.dtype)  # unmasked (tb,D) store


def _single_buffered_spec(shape, index_map):
    """Constant-index block -> single buffer (halves its VMEM footprint)."""
    try:
        return pl.BlockSpec(shape, index_map, pipeline_mode=pl.Buffered(1))
    except (TypeError, ValueError):   # older Pallas without pipeline_mode
        return pl.BlockSpec(shape, index_map)


def embedding_layer_forward(ids, emb_table, *, max_block_tokens=1024,
                            out_dtype=jnp.float32, use_onehot=None,
                            onehot_max_vocab=512):
    """ids: (B, S) integer token ids; emb_table: (V, D) float. Returns (B, S, D)."""
    B, S = ids.shape
    V, D = emb_table.shape
    ids = ids.astype(jnp.int32)
    emb_table = emb_table.astype(jnp.float32)
    row_bytes = D * 4
    table_bytes = V * row_bytes

    try:
        vmem_cap = int(pltpu.get_tpu_info().vmem_capacity_bytes)
    except Exception:
        vmem_cap = 64 << 20     # conservative (v7x has 64 MiB per TensorCore)

    # ---- choose the sequence block: biggest that fits next to the table ----
    budget = vmem_cap - table_bytes - (4 << 20)
    max_rows = max(8, budget // (row_bytes * 5))   # 2x PE + 2x out buffers + temp
    if S <= min(max_rows, max_block_tokens):
        tb, s_pad = S, S            # single block == full seq extent (any S ok)
    else:
        tb = max(128, (min(max_rows, max_block_tokens) // 128) * 128)
        s_pad = _round_up(S, tb)
    n_seq_blocks = s_pad // tb

    if use_onehot is None:
        # One-hot MXU gather only for small vocabs; threshold kept low enough
        # for v5e's slower MXU.  Larger vocabs use the jnp.take row-gather.
        use_onehot = V <= onehot_max_vocab

    out_itemsize = jnp.dtype(out_dtype).itemsize
    needed = (table_bytes                          # resident table (1 buffer)
              + 2 * B * tb * 4                     # ids blocks
              + 2 * tb * row_bytes                 # PE blocks
              + 2 * tb * D * out_itemsize          # output blocks
              + tb * row_bytes                     # gathered-rows temporary
              + (tb * V * 4 if use_onehot else 0)  # one-hot tile
              + (2 << 20))                         # headroom / internal scratch
    if needed > vmem_cap:
        # TODO(synk): fall back to an HBM row-gather path (memory_space=pl.ANY
        # + manual double-buffered row DMAs) for tables that exceed VMEM.
        raise NotImplementedError(
            f"kernel needs ~{needed >> 20} MiB VMEM but only {vmem_cap >> 20} "
            f"MiB is available on this TPU generation")
    vmem_limit = int(min(vmem_cap, max(needed, 32 << 20)))

    # ---- sequence padding (ids with index 0, PE with zero rows) ----
    if s_pad != S:
        ids = jnp.pad(ids, ((0, 0), (0, s_pad - S)))
    pe = _positional_encoding_table(S, D)
    if s_pad != S:
        pe = np.concatenate([pe, np.zeros((s_pad - S, D), np.float32)], axis=0)
    pe = jnp.asarray(pe)

    kernel = functools.partial(_embed_pe_kernel, use_onehot=use_onehot)
    cost = pl.CostEstimate(
        flops=B * s_pad * D + (2 * B * s_pad * V * D if use_onehot else 0),
        transcendentals=0,
        bytes_accessed=(table_bytes + B * s_pad * 4 + s_pad * row_bytes
                        + B * s_pad * D * out_itemsize))

    out = pl.pallas_call(
        kernel,
        out_shape=jax.ShapeDtypeStruct((B, s_pad, D), out_dtype),
        grid_spec=pltpu.PrefetchScalarGridSpec(
            num_scalar_prefetch=0,
            grid=(n_seq_blocks, B),         # batch innermost: ids/PE blocks reused
            in_specs=[
                pl.BlockSpec((B, tb), lambda s, b: (0, s)),            # ids
                _single_buffered_spec((V, D), lambda s, b: (0, 0)),    # table
                pl.BlockSpec((tb, D), lambda s, b: (s, 0)),            # PE rows
            ],
            out_specs=pl.BlockSpec((1, tb, D), lambda s, b: (b, s, 0)),
        ),
        compiler_params=pltpu.CompilerParams(
            dimension_semantics=("parallel", "parallel"),
            vmem_limit_bytes=vmem_limit),
        cost_estimate=cost,
    )(ids, emb_table, pe)

    return out[:, :S, :] if s_pad != S else out


def _reference(ids, emb_table):
    """Pure numpy reference reproducing the PyTorch module's math."""
    ids = np.asarray(ids)
    emb = np.asarray(emb_table)
    B, S = ids.shape
    D = emb.shape[1]
    positions = np.arange(S)
    dimensions = np.arange(D)
    denominator = np.power(10000.0, 2 * dimensions / D)
    input_angles = positions.reshape(-1, 1) / denominator.reshape(1, -1)
    pe = np.zeros_like(input_angles)
    pe[:, 0::2] = np.sin(input_angles[:, 0::2])
    pe[:, 1::2] = np.cos(input_angles[:, 1::2])
    return emb[ids] + pe[None].astype(np.float32)


if __name__ == "__main__":
    # Small shapes consistent with the module's (vocab_size, d_model) args.
    B, S, V, D = 2, 8, 64, 128

    key = jax.random.PRNGKey(0)
    k_emb, k_ids = jax.random.split(key)

    # Deterministic synthetic embedding table; padding_idx=0 row zeroed,
    # matching nn.Embedding(padding_idx=0) initialization semantics.
    emb_table = jax.random.normal(k_emb, (V, D), dtype=jnp.float32)
    emb_table = emb_table.at[0].set(0.0)

    ids = jax.random.randint(k_ids, (B, S), 0, V, dtype=jnp.int32)

    out = embedding_layer_forward(ids, emb_table)
    out = jax.block_until_ready(out)

    ref = _reference(ids, emb_table)
    np.testing.assert_allclose(np.asarray(out), ref, rtol=1e-5, atol=1e-4)
    print("KERNEL_OK")
</pallas_src>

<mosaic_0001>
module attributes {stable_mosaic.version = 11 : i64} {
  func.func @_embed_pe_kernel(%arg0: i32, %arg1: i32, %arg2: memref<2x8xi32, #tpu.memory_space<vmem>>, %arg3: memref<64x128xf32, #tpu.memory_space<vmem>>, %arg4: memref<8x128xf32, #tpu.memory_space<vmem>>, %arg5: memref<1x8x128xf32, #tpu.memory_space<vmem>>) attributes {dimension_semantics = [#tpu.dimension_semantics<parallel>, #tpu.dimension_semantics<parallel>], iteration_bounds = array<i64: 1, 2>, scalar_prefetch = 0 : i64, scratch_operands = 0 : i64, tpu.core_type = #tpu.core_type<tc>, window_params = [{transform_indices = @transform_0, window_bounds = array<i64: 2, 8>}, {pipeline_mode = #tpu.pipeline_mode<synchronous>, transform_indices = @transform_1, window_bounds = array<i64: 64, 128>}, {transform_indices = @transform_2, window_bounds = array<i64: 8, 128>}, {transform_indices = @transform_3, window_bounds = array<i64: 1, 8, 128>}]} {
    %0 = arith.index_cast %arg1 : i32 to index
    %c0 = arith.constant 0 : index
    %1 = vector.load %arg2[%0, %c0] : memref<2x8xi32, #tpu.memory_space<vmem>>, vector<1x8xi32>
    %2 = vector.shape_cast %1 : vector<1x8xi32> to vector<8xi32>
    %c0_i32 = arith.constant 0 : i32
    %c63_i32 = arith.constant 63 : i32
    %3 = vector.broadcast %c0_i32 : i32 to vector<8xi32>
    %4 = arith.maxsi %3, %2 : vector<8xi32>
    %5 = vector.broadcast %c63_i32 : i32 to vector<8xi32>
    %6 = arith.minsi %5, %4 : vector<8xi32>
    %7 = tpu.iota {dimensions = array<i32: 1>} : vector<8x64xi32>
    %8 = vector.shape_cast %6 : vector<8xi32> to vector<8x1xi32>
    %9 = vector.broadcast %8 : vector<8x1xi32> to vector<8x64xi32>
    %10 = arith.cmpi eq, %7, %9 : vector<8x64xi32>
    %11 = arith.extui %10 : vector<8x64xi1> to vector<8x64xi32>
    %12 = arith.sitofp %11 : vector<8x64xi32> to vector<8x64xf32>
    %c0_0 = arith.constant 0 : index
    %c0_1 = arith.constant 0 : index
    %13 = vector.load %arg3[%c0_0, %c0_1] : memref<64x128xf32, #tpu.memory_space<vmem>>, vector<64x128xf32>
    %cst = arith.constant dense<0.000000e+00> : vector<8x128xf32>
    %14 = tpu.matmul %12, %13, %cst {dimension_numbers = #tpu.dot_dimension_numbers<[1], [0], [0], [1], [0, 0, 1, 1], [], []>, precision = #tpu.contract_precision<fp32>} : vector<8x64xf32>, vector<64x128xf32>, vector<8x128xf32> -> vector<8x128xf32>
    %c0_2 = arith.constant 0 : index
    %c0_3 = arith.constant 0 : index
    %15 = vector.load %arg4[%c0_2, %c0_3] : memref<8x128xf32, #tpu.memory_space<vmem>>, vector<8x128xf32>
    %16 = arith.addf %14, %15 : vector<8x128xf32>
    %c0_4 = arith.constant 0 : index
    %c0_5 = arith.constant 0 : index
    %c0_6 = arith.constant 0 : index
    %17 = vector.load %arg5[%c0_4, %c0_5, %c0_6] : memref<1x8x128xf32, #tpu.memory_space<vmem>>, vector<1x8x128xf32>
    %18 = vector.shape_cast %17 : vector<1x8x128xf32> to vector<8x128xf32>
    %19 = vector.shape_cast %16 : vector<8x128xf32> to vector<1x8x128xf32>
    tpu.vector_store %arg5[%c0_4, %c0_5, %c0_6], %19 {strides = array<i32>} : memref<1x8x128xf32, #tpu.memory_space<vmem>>, vector<1x8x128xf32>,
    return
  }
  func.func @transform_0(%arg0: i32, %arg1: i32) -> (i32, i32) {
    %c0_i32 = arith.constant 0 : i32
    %c0_i32_0 = arith.constant 0 : i32
    return %c0_i32, %arg0 : i32, i32
  }
  func.func @transform_1(%arg0: i32, %arg1: i32) -> (i32, i32) {
    %c0_i32 = arith.constant 0 : i32
    %c0_i32_0 = arith.constant 0 : i32
    %c0_i32_1 = arith.constant 0 : i32
    return %c0_i32, %c0_i32_0 : i32, i32
  }
  func.func @transform_2(%arg0: i32, %arg1: i32) -> (i32, i32) {
    %c0_i32 = arith.constant 0 : i32
    %c0_i32_0 = arith.constant 0 : i32
    return %arg0, %c0_i32 : i32, i32
  }
  func.func @transform_3(%arg0: i32, %arg1: i32) -> (i32, i32, i32) {
    %c0_i32 = arith.constant 0 : i32
    %c0_i32_0 = arith.constant 0 : i32
    return %arg1, %arg0, %c0_i32 : i32, i32, i32
  }
}

</mosaic_0001>

<bundles_post_ra>
// kernel: tpu_custom_call.1
= control target key start
LH: loop header
LB: loop body
LE: loop exit
PB: predicated region body
PF: predicated region fallthrough
CT: control target
= control target key end

     0   :  { %8 = vsyncpa [#allocation3], 0  ;;  %s1702_s0 = inlined_call_operand.hbm [shape: s32[2,8], index: 0, kind: input, shape index: {}]   ;;  %s1703_s1 = inlined_call_operand.hbm [shape: f32[64,128], index: 1, kind: input, shape index: {}]   ;;  %s1704_s2 = inlined_call_operand.hbm [shape: f32[8,128], index: 2, kind: input, shape index: {}]   ;;  %s1705_s3 = inlined_call_operand.hbm [shape: f32[2,8,128], index: 3, kind: output, shape index: {}]  }
   0x1   :  { %9 = vsyncpa [#allocation6], 0 }
   0x2   :  { %10 = vsyncpa [#allocation4], 0 }
   0x3   :  { %12 = vsyncpa [#allocation4 + $0x1], 0  ;;  %s1362_s12 = smov 0   ;;  %s1364_s13 = smov 0  }
   0x4   :  { %s1366_s14 = smov 0   ;;  %s1368_s15 = smov 0  }
   0x5   :  { %s1370_s16 = smov 0   ;;  %s1372_s17 = smov 0  }
   0x6 LB: > { %s893_s18 = sadd.s32 4294967295, %s1332_s17   ;;  %s894_s19 = sadd.s32 4294967294, %s1332_s17   ;;  %s1332_s17 = sphi %s1372_s17, %s18_s17   ;;  %s1328_s16 = sphi %s1370_s16, %s1716_s16   ;;  %s1324_s15 = sphi %s1368_s15, %s1715_s15   ;;  %s1320_s14 = sphi %s1366_s14, %s1714_s14   ;;  %s1316_s13 = sphi %s1364_s13, %s1713_s13   ;;  %s1312_s12 = sphi %s1362_s12, %s1712_s12  }
   0x7   : > { %s27_s20 = sadd.s32 1, %s1328_s16  ;;  %s112_s21 = sadd.s32 1, %s1320_s14 }
   0x8   : > { %p28_p0 = scmp.ge.s32.totalorder %s27_s20, 2  ;;  %p122_p1 = scmp.ne.s32.totalorder %s1320_s14, %s1316_s13 }
   0x9   : > { %p123_p2 = scmp.eq.s32.totalorder %s893_s18, 1  ;;  %p128_p3 = scmp.ne.s32.totalorder %s1316_s13, %s1312_s12 }
   0xa   : > { %s1718_s20 = smov (%p28_p0, %s27_s20), 0  ;;  %p129_p5 = scmp.eq.s32.totalorder %s894_s19, 1 }
   0xb   : > { %p1402_p4 = por %p123_p2, %p122_p1  ;;  %s107_s23 = ssub.s32 %s1328_s16, %s1718_s20 }
   0xc   : > { %p895_p6 = scmp.ge.s32.totalorder %s1332_s17, 1  ;;  %p110_p7 = scmp.eq.s32.totalorder %s107_s23, 0 }
   0xd   : > { %p1409_p8 = por %p129_p5, %p128_p3  ;;  %p136_p9 = scmp.lt.s32.totalorder %s1332_s17, 3 }
   0xe   : > { %s1415_s25 = scalar_select %p110_p7, %s1320_s14, %s112_s21  }
   0xf   : > { %s1707_s24 = scalar_select %p1409_p8, 1, 0 }
  0x10   : > { %p1417_p10 = pnand %p895_p6, %p136_p9  ;;  %p1421_p11 = scmp.eq.s32.totalorder %s893_s18, 0 }
  0x11   : > { %s1334_s28 = smov [#allocation5]   ;;  %s1335_s4 = smov [#allocation2]  }
  0x12   : > { %p1094_p12 = pneg %p1417_p10  ;;  %s161_s29 = sshll.u32 %s1334_s28, 4  ;;  %s162_s29 = int_to_ptr.vmem [resolvable:$true] %s161_s29 }
  0x13   : > { %s151_s5 = sshll.u32 %s1335_s4, 4  ;;  %s1181_s6 = scalar_lea.vmem %s162_s29, 1024  ;;  %s152_s5 = int_to_ptr.vmem [resolvable:$true] %s151_s5 }
  0x14   : > { %p1429_p13 = pnand %p1421_p11, %p1094_p12  ;;  %p1182_p1 = scmp.ne.s32.totalorder %s162_s29, %s1181_s6 }
  0x15   : > { %p1189_p5 = scmp.lt.s32.totalorder %s162_s29, %s162_s29  ;;  %p1190_p6 = scmp.lt.s32.totalorder %s1181_s6, %s1181_s6 }
  0x16   : > { %p1172_p0 = pneg %p1429_p13 }
  0x17   : > { %p1191_p7 = por %p1190_p6, %p1189_p5 }
  0x18   : > { %p1184_p2 = pnand %p1182_p1, %p1172_p0 }
  0x1a   : > { %p1185_p3 = pneg %p1184_p2 }
  0x1c   : > { %p1192_p9 = pnand %p1191_p7, %p1185_p3 }
  0x1e   : > { %1195 = shalt.err (!%p1192_p9)
}
  0x1f   : > { %s1336_s7 = smov 128   ;;  %s1337_s8 = smov 8  }
  0x20   : > { %1100 = dma.hbm_to_vmem [thread:$0]  (!%p1429_p13), %s1703_s1, 1024, %s162_s29, [#allocation6], %s1336_s7, %s1336_s7, %s1337_s8  }
  0x21   : > { %s1207_s11 = scalar_lea.vmem %s152_s5, 32  ;;  %p1215_p8 = scmp.lt.s32.totalorder %s152_s5, %s152_s5 }
  0x22   : > { %p1208_p12 = scmp.ne.s32.totalorder %s152_s5, %s1207_s11  ;;  %p1216_p5 = scmp.lt.s32.totalorder %s1207_s11, %s1207_s11 }
  0x24   : > { %p1210_p1 = pnand %p1208_p12, %p1172_p0  ;;  %p1217_p3 = por %p1216_p5, %p1215_p8 }
  0x26   : > { %p1211_p2 = pneg %p1210_p1 }
  0x28   : > { %p1218_p6 = pnand %p1217_p3, %p1211_p2 }
  0x2a   : > { %1221 = shalt.err (!%p1218_p6)
}
  0x2b   : > { %1097 = dma.hbm_to_vmem [thread:$0]  (!%p1429_p13), %s1702_s0, 32, %s152_s5, [#allocation3]  }
  0x2c   : > { %s1338_s21 = smov [#allocation7]  }
  0x2d   : > { %s177_s23 = sshll.u32 %s1338_s21, 4  ;;  %s178_s23 = int_to_ptr.vmem [resolvable:$true] %s177_s23 }
  0x2e   : > { %s1233_s28 = scalar_lea.vmem %s178_s23, 128  ;;  %p1241_p1 = scmp.lt.s32.totalorder %s178_s23, %s178_s23 }
  0x2f   : > { %p1234_p7 = scmp.ne.s32.totalorder %s178_s23, %s1233_s28  ;;  %p1242_p8 = scmp.lt.s32.totalorder %s1233_s28, %s1233_s28 }
  0x31   : > { %p1236_p9 = pnand %p1234_p7, %p1172_p0  ;;  %p1243_p2 = por %p1242_p8, %p1241_p1 }
  0x33   : > { %p1237_p12 = pneg %p1236_p9 }
  0x35   : > { %p1244_p5 = pnand %p1243_p2, %p1237_p12 }
  0x37   : > { %1247 = shalt.err (!%p1244_p5)
}
  0x38   : > { %1103 = dma.hbm_to_vmem [thread:$0]  (!%p1429_p13), %s1704_s2, 128, %s178_s23, [#allocation6]  }
  0x39   : > { %190 = sbr.rel (%p1417_p10) target bundleno = 443 (0x1bb), region = 32 }
  0x3e   : > { %1299 = dma.done.wait (%p1421_p11), [#allocation3], 32  }
  0x3f   : > { %1301 = vsyncadd (%p1421_p11), [#allocation3], 4294967264 }
  0x40   : > { %1303 = dma.done.wait (%p1421_p11), [#allocation6], 1152  }
  0x41   : > { %1305 = vsyncadd (%p1421_p11), [#allocation6], 4294966144  ;;  %v223_v0 = vlaneseq  ;;  %v1339_v1 = vmov 0.0   ;;  %vm1340_vm0 = vmmov 0   ;;  %s217_s26 = scalar_lea.vmem [#allocation2], %s1324_s15  ;;  %v242_v5 = vld [vmem:[#allocation5 + $0x38] sm:$0xff] }
  0x42   : > { %985 = vmatprep.subr.mxu1 %v1339_v1  ;;  %966 = vmatprep.subr.mxu0 %v1339_v1  ;;  %v218_v3 = vld [vmem:[%s217_s26] sm:$0x1]  ;;  %v241_v6 = vld [vmem:[#allocation5 + $0x30] sm:$0xff]  ;;  %v1477_v7 = vand.u32 4294901760, %v242_v5  ;;  %v240_v9 = vld [vmem:[#allocation5 + $0x28] sm:$0xff]  ;;  %vm244_vm3 = vcmask 523264  }
  0x43   : > { %1001 = vmatprep.mubr.msk.f32.mxu1 %vm1340_vm0, %v1339_v1  ;;  %982 = vmatprep.mubr.msk.f32.mxu0 %vm1340_vm0, %v1339_v1  ;;  %v226_v2 = vshrl.u32 %v223_v0, 7  ;;  %vm219_vm1 = vcmp.gt.s32.totalorder %v218_v3, 0  ;;  %v1479_v8 = vand.u32 4294901760, %v241_v6  ;;  %v239_v10 = vld [vmem:[#allocation5 + $0x20] sm:$0xff]  ;;  %v238_v11 = vld [vmem:[#allocation5 + $0x18] sm:$0xff]  ;;  %v1481_v13 = vand.u32 4294901760, %v240_v9 }
  0x44   : > { %v220_v12 = vsel %vm219_vm1, %v218_v3, 0  ;;  %v1483_v14 = vand.u32 4294901760, %v239_v10  ;;  %v1485_v15 = vand.u32 4294901760, %v238_v11  ;;  %v237_v16 = vld [vmem:[#allocation5 + $0x10] sm:$0xff]  ;;  %v1488_v17 = vsub.f32 %v242_v5, %v1477_v7  ;;  %967 = vmatpush3.msra.mxu0 %v1477_v7  ;;  %v236_v20 = vld [vmem:[#allocation5 + $0x8] sm:$0xff]  ;;  %v235_v25 = vld [vmem:[#allocation5] sm:$0xff] }
  0x45   : > { %v227_v4 = vsub.s32 0, %v226_v2  ;;  %vm221_vm2 = vcmp.lt.s32.totalorder %v220_v12, 63  ;;  %v1491_v18 = vsub.f32 %v241_v6, %v1479_v8  ;;  %v1494_v19 = vand.u32 4294901760, %v237_v16  ;;  %968 = vmatprep.subr.mxu0 %v1339_v1  ;;  %s214_s27 = sand.u32 1, %s1316_s13   ;;  %s909_s5 = sshll.u32 %s1324_s15, 7 }
  0x46   : > { %v222_v21 = vsel %vm221_vm2, %v220_v12, 63  ;;  %v1497_v22 = vsub.f32 %v240_v9, %v1481_v13  ;;  %v1500_v23 = vsub.f32 %v239_v10, %v1483_v14  ;;  %v1503_v24 = vsub.f32 %v238_v11, %v1485_v15  ;;  %969 = vmatpush3.msra.mxu0 %v1479_v8  ;;  %v243_v9 = vld [vmem:[#allocation7] sm:$0xff]  ;;  %s903_s30 = sshll.u32 %s214_s27, 3  ;;  %s799_s10 = scalar_lea.hbm %s1705_s3, %s909_s5 }
  0x47   : > { %v228_v26 = vrot.slane %v222_v21, %v227_v4  ;;  %v350_v27 = vand.u32 4294901760, %v1488_v17  ;;  %v357_v28 = vand.u32 4294901760, %v1491_v18  ;;  %v1509_v29 = vsub.f32 %v237_v16, %v1494_v19  ;;  %970 = vmatprep.subr.mxu0 %v1339_v1  ;;  %s216_s6 = scalar_lea.vmem [#allocation8], %s903_s30  ;;  %s787_s11 = scalar_lea.sflag [#allocation4], %s214_s27 }
  0x48   : > { %v364_v30 = vand.u32 4294901760, %v1497_v22  ;;  %v371_v31 = vand.u32 4294901760, %v1500_v23  ;;  %v1515_v32 = vand.u32 4294901760, %v236_v20  ;;  %v378_v35 = vand.u32 4294901760, %v1503_v24  ;;  %971 = vmatpush3.msra.mxu0 %v1481_v13  ;;  %s801_s7 = sshll.u32 %s216_s6, 4  ;;  %s1341_s19 = smov [#allocation8]   ;;  %s802_s7 = int_to_ptr.vmem [resolvable:$true] %s801_s7 }
  0x49   : > { %230 = vbcast.lane.b32.xlu0 %v228_v26, 256  ;;  %v351_v33 = vsub.f32 %v1488_v17, %v350_v27  ;;  %v358_v34 = vsub.f32 %v1491_v18, %v357_v28  ;;  %v1525_v36 = vand.u32 4294901760, %v235_v25  ;;  %v385_v38 = vand.u32 4294901760, %v1509_v29  ;;  %972 = vmatprep.subr.mxu0 %v1339_v1  ;;  %s1248_s18 = scalar_lea.vmem %s802_s7, 128  ;;  %s1252_s21 = sshll.u32 %s1341_s19, 4  ;;  %s1253_s21 = int_to_ptr.vmem [resolvable:$false] %s1252_s21 }
  0x4a   : > { %v365_v37 = vsub.f32 %v1497_v22, %v364_v30  ;;  %v1532_v39 = vsub.f32 %v236_v20, %v1515_v32  ;;  %v372_v42 = vsub.f32 %v1500_v23, %v371_v31  ;;  %973 = vmatpush3.msra.mxu0 %v1483_v14  ;;  %v379_v45 = vsub.f32 %v1503_v24, %v378_v35  ;;  %p1249_p10 = scmp.ne.s32.totalorder %s802_s7, %s1248_s18  ;;  %s1254_s15 = scalar_lea.vmem %s1253_s21, 256 }
  0x4b   : > { %v352_v40 = vand.u32 4294901760, %v351_v33  ;;  %v359_v41 = vand.u32 4294901760, %v358_v34  ;;  %v1539_v43 = vsub.f32 %v235_v25, %v1525_v36  ;;  %974 = vmatprep.subr.mxu0 %v1339_v1  ;;  %v386_v48 = vsub.f32 %v1509_v29, %v385_v38  ;;  %p1255_p0 = scmp.lt.s32.totalorder %s802_s7, %s1253_s21  ;;  %p1256_p3 = scmp.lt.s32.totalorder %s1254_s15, %s1248_s18 }
  0x4c   : > { %v366_v44 = vand.u32 4294901760, %v365_v37  ;;  %v392_v46 = vand.u32 4294901760, %v1532_v39  ;;  %975 = vmatpush3.msra.mxu0 %v1485_v15  ;;  %v373_v47 = vand.u32 4294901760, %v372_v42  ;;  %v380_v50 = vand.u32 4294901760, %v379_v45  ;;  %p1250_p11 = pnand %p1249_p10, %p1402_p4 }
  0x4d   : > { %986 = vmatpush3.msra.mxu1 %v352_v40  ;;  %976 = vmatprep.subr.mxu0 %v1339_v1  ;;  %v399_v49 = vand.u32 4294901760, %v1539_v43  ;;  %v387_v52 = vand.u32 4294901760, %v386_v48  ;;  %v224_v56 = vand.u32 127, %v223_v0  ;;  %p1257_p6 = por %p1256_p3, %p1255_p0 }
  0x4e   : > { %987 = vmatprep.subr.mxu1 %v1339_v1  ;;  %977 = vmatpush3.msra.mxu0 %v1494_v19  ;;  %v393_v51 = vsub.f32 %v1532_v39, %v392_v46  ;;  %p1251_p13 = pneg %p1250_p11 }
  0x4f   : > { %988 = vmatpush3.msra.mxu1 %v359_v41  ;;  %978 = vmatprep.subr.mxu0 %v1339_v1  ;;  %v400_v53 = vsub.f32 %v1539_v43, %v399_v49 }
  0x50   : > { %989 = vmatprep.subr.mxu1 %v1339_v1  ;;  %979 = vmatpush3.msra.mxu0 %v1515_v32  ;;  %v394_v54 = vand.u32 4294901760, %v393_v51  ;;  %p1258_p7 = pnand %p1257_p6, %p1251_p13 }
  0x51   : > { %990 = vmatpush3.msra.mxu1 %v366_v44  ;;  %980 = vmatprep.subr.mxu0 %v1339_v1  ;;  %v401_v55 = vand.u32 4294901760, %v400_v53 }
  0x52   : > { %991 = vmatprep.subr.mxu1 %v1339_v1  ;;  %981 = vmatpush3.msra.mxu0 %v1525_v36 }
  0x53   : > { %992 = vmatpush3.msra.mxu1 %v373_v47  ;;  %1004 = vmatprep.subr.mxu0 %v1339_v1 }
  0x54   : > { %993 = vmatprep.subr.mxu1 %v1339_v1 }
  0x55   : > { %994 = vmatpush3.msra.mxu1 %v380_v50 }
  0x56   : > { %995 = vmatprep.subr.mxu1 %v1339_v1 }
  0x57   : > { %996 = vmatpush3.msra.mxu1 %v387_v52 }
  0x58   : > { %997 = vmatprep.subr.mxu1 %v1339_v1 }
  0x59   : > { %998 = vmatpush3.msra.mxu1 %v394_v54 }
  0x5a   : > { %999 = vmatprep.subr.mxu1 %v1339_v1 }
  0x5b   : > { %1000 = vmatpush3.msra.mxu1 %v401_v55 }
  0x5c   : > { %1023 = vmatprep.subr.mxu1 %v1339_v1 }
  0xbb   : > { %v231_v57 = vpop.permute.xlu0 %230 }
  0xbc   : > { %vm232_vm4 = vcmp.eq.s32.totalorder %v224_v56, %v231_v57 }
  0xbd   : > { %v1575_v58 = vsel %vm232_vm4, 1.0, %v1339_v1 }
  0xbe   : > { %v246_v59 = vsel %vm244_vm3, %v1575_v58, 0  ;;  %1002 = vmatmul.mubr.msk.f32.vlgmr.msra.gmra.mxu1 %vm244_vm3, %v1575_v58 }
  0xbf   : > { %v322_v60 = vsub.f32 %v246_v59, %v246_v59  ;;  %1024 = vmatpush3.msra.mxu1 %v1477_v7  ;;  %1039 = vmatprep.mubr.msk.f32.mxu1 %vm1340_vm0, %v1339_v1 }
  0xc0   : > { %1025 = vmatprep.subr.mxu1 %v1339_v1 }
  0xc1   : > { %1026 = vmatpush3.msra.mxu1 %v1479_v8  ;;  %v323_v61 = vand.u32 4294901760, %v322_v60 }
  0xc2   : > { %1027 = vmatprep.subr.mxu1 %v1339_v1 }
  0xc3   : > { %1028 = vmatpush3.msra.mxu1 %v1481_v13  ;;  %v324_v62 = vsub.f32 %v322_v60, %v323_v61 }
  0xc4   : > { %1029 = vmatprep.subr.mxu1 %v1339_v1 }
  0xc5   : > { %1030 = vmatpush3.msra.mxu1 %v1483_v14  ;;  %v325_v63 = vand.u32 4294901760, %v324_v62 }
  0xc6   : > { %1031 = vmatprep.subr.mxu1 %v1339_v1 }
  0xc7   : > { %1032 = vmatpush3.msra.mxu1 %v1485_v15  ;;  %983 = vmatmul.mubr.f32.vlgmr.msra.gmra.mxu0 %v325_v63 }
  0xc8   : > { %1005 = vmatpush3.msra.mxu0 %v1488_v17  ;;  %1033 = vmatprep.subr.mxu1 %v1339_v1 }
  0xc9   : > { %1006 = vmatprep.subr.mxu0 %v1339_v1  ;;  %1034 = vmatpush3.msra.mxu1 %v1494_v19 }
  0xca   : > { %1007 = vmatpush3.msra.mxu0 %v1491_v18  ;;  %1035 = vmatprep.subr.mxu1 %v1339_v1 }
  0xcb   : > { %1008 = vmatprep.subr.mxu0 %v1339_v1  ;;  %1036 = vmatpush3.msra.mxu1 %v1515_v32 }
  0xcc   : > { %1009 = vmatpush3.msra.mxu0 %v1497_v22  ;;  %1037 = vmatprep.subr.mxu1 %v1339_v1 }
  0xcd   : > { %1010 = vmatprep.subr.mxu0 %v1339_v1  ;;  %1038 = vmatpush3.msra.mxu1 %v1525_v36 }
  0xce   : > { %1011 = vmatpush3.msra.mxu0 %v1500_v23  ;;  %1040 = vmatmul.mubr.f32.vlgmr.msra.gmra.mxu1 %v323_v61 }
  0xcf   : > { %1061 = vmatprep.subr.mxu1 %v1339_v1  ;;  %1012 = vmatprep.subr.mxu0 %v1339_v1 }
  0xd0   : > { %1062 = vmatpush3.msra.mxu1 %v1477_v7  ;;  %1013 = vmatpush3.msra.mxu0 %v1503_v24 }
  0xd1   : > { %1063 = vmatprep.subr.mxu1 %v1339_v1  ;;  %1014 = vmatprep.subr.mxu0 %v1339_v1 }
  0xd2   : > { %1064 = vmatpush3.msra.mxu1 %v1479_v8  ;;  %1015 = vmatpush3.msra.mxu0 %v1509_v29 }
  0xd3   : > { %1065 = vmatprep.subr.mxu1 %v1339_v1  ;;  %1016 = vmatprep.subr.mxu0 %v1339_v1 }
  0xd4   : > { %1066 = vmatpush3.msra.mxu1 %v1481_v13  ;;  %1017 = vmatpush3.msra.mxu0 %v1532_v39 }
  0xd5   : > { %1067 = vmatprep.subr.mxu1 %v1339_v1  ;;  %1018 = vmatprep.subr.mxu0 %v1339_v1 }
  0xd6   : > { %1068 = vmatpush3.msra.mxu1 %v1483_v14  ;;  %1019 = vmatpush3.msra.mxu0 %v1539_v43 }
  0xd7   : > { %1020 = vmatprep.mubr.msk.f32.mxu0 %vm1340_vm0, %v1339_v1  ;;  %1069 = vmatprep.subr.mxu1 %v1339_v1 }
  0xd8   : > { %1021 = vmatmul.mubr.f32.vlgmr.msra.gmra.mxu0 %v322_v60  ;;  %1042 = vmatprep.subr.mxu0 %v1339_v1 }
  0xd9   : > { %1070 = vmatpush3.msra.mxu1 %v1485_v15  ;;  %1043 = vmatpush3.msra.mxu0 %v350_v27 }
  0xda   : > { %1071 = vmatprep.subr.mxu1 %v1339_v1  ;;  %1044 = vmatprep.subr.mxu0 %v1339_v1 }
  0xdb   : > { %1072 = vmatpush3.msra.mxu1 %v1494_v19  ;;  %1045 = vmatpush3.msra.mxu0 %v357_v28 }
  0xdc   : > { %1073 = vmatprep.subr.mxu1 %v1339_v1  ;;  %1046 = vmatprep.subr.mxu0 %v1339_v1 }
  0xdd   : > { %1074 = vmatpush3.msra.mxu1 %v1515_v32  ;;  %1047 = vmatpush3.msra.mxu0 %v364_v30 }
  0xde   : > { %1075 = vmatprep.subr.mxu1 %v1339_v1  ;;  %1048 = vmatprep.subr.mxu0 %v1339_v1 }
  0xdf   : > { %1076 = vmatpush3.msra.mxu1 %v1525_v36  ;;  %1077 = vmatprep.mubr.msk.f32.mxu1 %vm1340_vm0, %v1339_v1 }
  0xe0   : > { %1049 = vmatpush3.msra.mxu0 %v371_v31  ;;  %1078 = vmatmul.mubr.msk.f32.vlgmr.msra.gmra.mxu1 %vm244_vm3, %v1575_v58 }
  0xe1   : > { %1050 = vmatprep.subr.mxu0 %v1339_v1  ;;  %1058 = vmatprep.mubr.msk.f32.mxu0 %vm1340_vm0, %v1339_v1 }
  0xe2   : > { %1051 = vmatpush3.msra.mxu0 %v378_v35 }
  0xe3   : > { %1052 = vmatprep.subr.mxu0 %v1339_v1 }
  0xe4   : > { %1053 = vmatpush3.msra.mxu0 %v385_v38 }
  0xe5   : > { %1054 = vmatprep.subr.mxu0 %v1339_v1 }
  0xe6   : > { %1055 = vmatpush3.msra.mxu0 %v392_v46 }
  0xe7   : > { %1056 = vmatprep.subr.mxu0 %v1339_v1 }
  0xe8   : > { %1057 = vmatpush3.msra.mxu0 %v399_v49 }
  0xe9   : > { %1059 = vmatmul.mubr.msk.f32.vlgmr.msra.gmra.mxu0 %vm244_vm3, %v1575_v58 }
 0x17e   : > { %v438_v0 = vpop.f32.mrf.mxu1 }
 0x180   : > { %v1003_v2 = vpop.f32.mrf.mxu1 }
 0x187   : > { %v327_v3 = vpop.f32.mrf.mxu0 }
 0x188   : > { %v328_v10 = vadd.f32 %v327_v3, %v243_v9 }
 0x189   : > { %v984_v4 = vpop.f32.mrf.mxu0 }
 0x18a   : > { %v439_v1 = vadd.f32 %v438_v0, %v328_v10 }
 0x18e   : > { %v607_v5 = vpop.f32.mrf.mxu1 }
 0x190   : > { %v1041_v6 = vpop.f32.mrf.mxu1 }
 0x198   : > { %v526_v7 = vpop.f32.mrf.mxu0 }
 0x199   : > { %v527_v13 = vadd.f32 %v526_v7, %v439_v1 }
 0x19a   : > { %v1022_v8 = vpop.f32.mrf.mxu0 }
 0x19b   : > { %v608_v14 = vadd.f32 %v607_v5, %v527_v13 }
 0x1a0   : > { %v781_v11 = vpop.f32.mrf.mxu1 }
 0x1a2   : > { %v1079_v12 = vpop.f32.mrf.mxu1 }
 0x1a9   : > { %v702_v15 = vpop.f32.mrf.mxu0 }
 0x1aa   : > { %v703_v16 = vadd.f32 %v702_v15, %v608_v14 }
 0x1ab   : > { %v1060_v17 = vpop.f32.mrf.mxu0 }
 0x1ac   : > { %v782_v18 = vadd.f32 %v781_v11, %v703_v16 }
 0x1ae   : > { %785 = vst [vmem:[%s216_s6] sm:$0xff] %v782_v18 }
 0x1af   : > { %1261 = shalt.err (!%p1258_p7)
}
 0x1b0   : > { %s1262_s23 = scalar_lea.hbm %s799_s10, 128  ;;  %s1266_s4 = scalar_lea.hbm %s1705_s3, 256 }
 0x1b1   : > { %p1263_p9 = scmp.ne.s32.totalorder %s799_s10, %s1262_s23  ;;  %p1267_p8 = scmp.lt.s32.totalorder %s799_s10, %s1705_s3 }
 0x1b2   : > { %p1268_p2 = scmp.lt.s32.totalorder %s1266_s4, %s1262_s23 }
 0x1b3   : > { %p1264_p12 = pnand %p1263_p9, %p1402_p4 }
 0x1b4   : > { %p1269_p5 = por %p1268_p2, %p1267_p8 }
 0x1b5   : > { %p1265_p1 = pneg %p1264_p12 }
 0x1b7   : > { %p1270_p10 = pnand %p1269_p5, %p1265_p1 }
 0x1b9   : > { %1273 = shalt.err (!%p1270_p10)
}
 0x1ba   : > { %1092 = dma.vmem_to_hbm [thread:$0]  (%p1402_p4), %s802_s7, 128, %s799_s10, %s787_s11  }
 0x1bb PF: > { %p1114_p11 = scmp.ge.s32.totalorder %s1332_s17, 2  ;;  %s813_s30 = sand.u32 1, %s1312_s12  }
 0x1bc   : > { %p1711_p13 = scmp.ne.s32.totalorder %s1707_s24, 0  ;;  %s814_s5 = scalar_lea.sflag [#allocation4], %s813_s30 }
 0x1be   : > { %p1105_p0 = pnand %p1114_p11, %p1711_p13 }
 0x1c0   : > { %p1106_p3 = pneg %p1105_p0 }
 0x1c2   : > { %1307 = dma.done.wait (%p1106_p3), %s814_s5, 128  }
 0x1c3   : > { %1309 = vsyncadd (%p1106_p3), %s814_s5, 4294967168  ;;  %s18_s17 = sadd.s32 1, %s1332_s17   ;;  %s1712_s12 = smov %s1316_s13 }
 0x1c4   : > { %p15_p6 = scmp.ge.s32.totalorder %s18_s17, 4   ;;  %s1713_s13 = smov %s1320_s14 }
 0x1c5   : > { %s1714_s14 = smov %s1415_s25  ;;  %s1715_s15 = smov %s1328_s16 }
 0x1c6   : > { %s1716_s16 = smov %s1718_s20  ;;  %17 = sbr.rel (!%p15_p6) target bundleno = 6 (0x6), region = 80 }
 0x1cb   :  { %819 = vsyncpa [#allocation3], 1 }
 0x1cc   :  { %821 = vsyncpa [#allocation3 + $0x1], 1 }
 0x1cd   :  { %822 = vsyncpa [#allocation6], 1 }
 0x1ce   :  { %823 = vsyncpa [#allocation4], 1 }
 0x1cf   :  { %825 = vsyncpa [#allocation4 + $0x1], 1 }

</bundles_post_ra>
